<compile_context>
chip_gen: v5e
topology: v5e:2x2
jax: 0.10.0
libtpu: 0.0.40
codegen_flags: <defaults>
</compile_context>

<pallas_src>
import functools

import jax
import jax.numpy as jnp
from jax.experimental import pallas as pl
from jax.experimental.pallas import tpu as pltpu

LN_EPS = 1e-12  # BERT default layer_norm_eps

_VMEM_CAP_BYTES = 52 * 1024 * 1024  # stay well inside v7x's 64 MiB physical per-TC VMEM


def _round_up(x, m):
    return ((x + m - 1) // m) * m


def _pick_tm(m, tm_max, min_steps):
    """Row-tile size: large (MXU-friendly) but small enough that the 'parallel' grid axis has
    >= min_steps steps (v7x megacore sharding + pipelining), 16-row aligned for bf16 packing."""
    tm_max = max(8, _round_up(tm_max, 16))
    target = pl.cdiv(m, max(1, min_steps))
    if target <= 8:
        tm = 8                       # smallest sublane-aligned tile
    else:
        tm = _round_up(target, 16)   # bf16 packs 2 rows per sublane
    return min(tm, tm_max)


def _estimate_vmem_bytes(tm, inter, hidden, hs_dt, in_dt, out_dt, w_dt):
    """Rough VMEM footprint: resident weights + double-buffered streamed tiles + f32 temporaries."""
    isz = lambda dt: jnp.dtype(dt).itemsize
    resident = inter * hidden * isz(w_dt) + hidden * hidden * isz(w_dt) + 8 * hidden * 4
    streamed = 2 * tm * (inter * isz(hs_dt) + hidden * isz(in_dt) + hidden * isz(out_dt))
    scratch = tm * inter * isz(w_dt) + 5 * tm * hidden * 4
    return resident + streamed + scratch


def _fused_kernel(hs_ref, in_ref, wd_ref, wk_ref, vec_ref, o_ref, *, ln_eps):
    w_dtype = wd_ref.dtype
    # Packed per-feature vectors (f32): row 0 = dense bias, 1 = kron bias, 2 = LN gamma, 3 = LN beta.
    bd = vec_ref[0:1, :]
    bk = vec_ref[1:2, :]
    g = vec_ref[2:3, :]
    be = vec_ref[3:4, :]

    # Dense: (TM, I) @ (I, H) on the MXU; operands cast per-tile to the weight dtype, f32 accumulation.
    h = jnp.dot(hs_ref[...].astype(w_dtype), wd_ref[...], preferred_element_type=jnp.float32) + bd

    # TODO(synk): nn.Dropout layers are identity here (inference semantics); no RNG dropout applied.

    # Kronecker adapter: relu(h @ kron(B, A)) + bias, then CustomAdapter residual (x + rep).
    z = jnp.dot(h.astype(w_dtype), wk_ref[...], preferred_element_type=jnp.float32)
    rep = jnp.maximum(z, 0.0) + bk

    # Residual with the block input; accumulate in f32 even if the residual is streamed in bf16.
    y = h + rep + in_ref[...].astype(jnp.float32)

    # LayerNorm over the feature dim (no padding / masking: feature dim is never padded).
    inv_h = 1.0 / float(y.shape[-1])
    mean = jnp.sum(y, axis=-1, keepdims=True) * inv_h
    centered = y - mean
    var = jnp.sum(centered * centered, axis=-1, keepdims=True) * inv_h
    norm = centered * jax.lax.rsqrt(var + ln_eps)

    o_ref[...] = (norm * g + be).astype(o_ref.dtype)


def prepare_params(params, matmul_dtype=jnp.bfloat16):
    """One-time parameter preprocessing (hoisted out of the per-call path): materialize
    kron(B, A), cast matmul weights to `matmul_dtype`, and pack the four per-feature vectors
    into a single (8, H) f32 array -> one resident DMA instead of four."""
    inter, hidden = params["dense_w"].shape

    w_dense = params["dense_w"].astype(matmul_dtype)                      # (I, H)
    w_kron = jnp.kron(params["kron_B"], params["kron_A"]).astype(matmul_dtype)  # (H, H)

    vecs = jnp.zeros((8, hidden), jnp.float32)
    vecs = vecs.at[0].set(params["dense_b"].astype(jnp.float32))
    vecs = vecs.at[1].set(params["kron_bias"].astype(jnp.float32))
    vecs = vecs.at[2].set(params["ln_gamma"].astype(jnp.float32))
    vecs = vecs.at[3].set(params["ln_beta"].astype(jnp.float32))

    return {"w_dense": w_dense, "w_kron": w_kron, "vecs": vecs, "H": hidden, "I": inter}


def custom_adapter_bert_output(hidden_states, input_tensor, prepared, *, tm=512,
                               out_dtype=None, min_grid_steps=4):
    """hidden_states: (B, S, I); input_tensor: (B, S, H) -> (B, S, H) in `out_dtype`
    (defaults to hidden_states.dtype, i.e. the network's activation dtype)."""
    batch, seq, inter = hidden_states.shape
    hidden = prepared["H"]
    assert inter == prepared["I"] and input_tensor.shape[-1] == hidden

    m = batch * seq
    out_dtype = hidden_states.dtype if out_dtype is None else jnp.dtype(out_dtype)
    w_dtype = prepared["w_dense"].dtype

    # No casts, no pads: reshapes of contiguous arrays are free; all casting is per-tile in-kernel.
    hs2d = hidden_states.reshape(m, inter)
    in2d = input_tensor.reshape(m, hidden)

    # Tile size + VMEM budget (shrink tm if the footprint would blow the v7x cap).
    tm_eff = _pick_tm(m, tm, min_grid_steps)

    def est(t):
        return int(1.3 * _estimate_vmem_bytes(t, inter, hidden, hs2d.dtype, in2d.dtype,
                                              out_dtype, w_dtype)) + (2 << 20)

    while tm_eff > 16 and est(tm_eff) > _VMEM_CAP_BYTES:
        tm_eff = max(16, _round_up(tm_eff // 2, 16))
    vmem_limit = max(32 << 20, min(est(tm_eff), _VMEM_CAP_BYTES))

    grid = (pl.cdiv(m, tm_eff),)  # ragged last tile handled by Pallas boundary clipping

    flops = 2 * m * (inter * hidden + hidden * hidden)
    bytes_accessed = int(
        hs2d.size * hs2d.dtype.itemsize
        + in2d.size * in2d.dtype.itemsize
        + m * hidden * jnp.dtype(out_dtype).itemsize
        + prepared["w_dense"].size * prepared["w_dense"].dtype.itemsize
        + prepared["w_kron"].size * prepared["w_kron"].dtype.itemsize
        + prepared["vecs"].size * 4
    )

    kernel = functools.partial(_fused_kernel, ln_eps=LN_EPS)

    out2d = pl.pallas_call(
        kernel,
        out_shape=jax.ShapeDtypeStruct((m, hidden), out_dtype),
        grid_spec=pltpu.PrefetchScalarGridSpec(
            num_scalar_prefetch=0,
            grid=grid,
            in_specs=[
                # streamed per-row tiles (double-buffered by default)
                pl.BlockSpec((tm_eff, inter), lambda i: (i, 0)),
                pl.BlockSpec((tm_eff, hidden), lambda i: (i, 0)),
                # resident constants: single-buffered to save VMEM
                pl.BlockSpec((inter, hidden), lambda i: (0, 0), pipeline_mode=pl.Buffered(1)),
                pl.BlockSpec((hidden, hidden), lambda i: (0, 0), pipeline_mode=pl.Buffered(1)),
                pl.BlockSpec((8, hidden), lambda i: (0, 0), pipeline_mode=pl.Buffered(1)),
            ],
            out_specs=pl.BlockSpec((tm_eff, hidden), lambda i: (i, 0)),
        ),
        compiler_params=pltpu.CompilerParams(
            dimension_semantics=("parallel",),
            vmem_limit_bytes=int(vmem_limit),
        ),
        cost_estimate=pl.CostEstimate(
            flops=flops, transcendentals=m, bytes_accessed=bytes_accessed
        ),
    )(hs2d, in2d, prepared["w_dense"], prepared["w_kron"], prepared["vecs"])

    return out2d.reshape(batch, seq, hidden)


def _reference(hidden_states, input_tensor, params):
    h = hidden_states @ params["dense_w"] + params["dense_b"]
    w_kron = jnp.kron(params["kron_B"], params["kron_A"])
    rep = jnp.maximum(h @ w_kron, 0.0) + params["kron_bias"]
    y = h + rep + input_tensor
    mean = jnp.mean(y, axis=-1, keepdims=True)
    var = jnp.mean((y - mean) ** 2, axis=-1, keepdims=True)
    return (y - mean) * jax.lax.rsqrt(var + LN_EPS) * params["ln_gamma"] + params["ln_beta"]


if __name__ == "__main__":
    # Small config consistent with the module:
    batch, seq = 2, 8
    hidden_size = 32
    intermediate_size = 64
    r = [4, 4]  # r[0] divides hidden_size, r[-1] divides hidden_size

    key = jax.random.PRNGKey(0)
    ks = jax.random.split(key, 8)

    hidden_states = jax.random.normal(ks[0], (batch, seq, intermediate_size), jnp.float32)
    input_tensor = jax.random.normal(ks[1], (batch, seq, hidden_size), jnp.float32)

    # Deterministic synthetic parameters (shapes from __init__; tie_weights=False).
    params = {
        "dense_w": jax.random.normal(ks[2], (intermediate_size, hidden_size), jnp.float32) * 0.05,
        "dense_b": jax.random.normal(ks[3], (hidden_size,), jnp.float32) * 0.05,
        "kron_A": jax.random.normal(ks[4], (r[0], r[-1]), jnp.float32) * 0.02,
        "kron_B": jax.random.normal(ks[5], (hidden_size // r[0], hidden_size // r[-1]), jnp.float32) * 0.02,
        "kron_bias": jnp.zeros((hidden_size,), jnp.float32),
        "ln_gamma": jnp.ones((hidden_size,), jnp.float32),
        "ln_beta": jnp.zeros((hidden_size,), jnp.float32),
    }

    ref = _reference(hidden_states, input_tensor, params)

    # 1) exact f32 weight path (sanity: identical math up to reduction order)
    prep_f32 = prepare_params(params, matmul_dtype=jnp.float32)
    out_f32 = jax.block_until_ready(custom_adapter_bert_output(hidden_states, input_tensor, prep_f32))
    assert out_f32.shape == (batch, seq, hidden_size)
    assert out_f32.dtype == hidden_states.dtype
    assert jnp.allclose(out_f32, ref, atol=1e-5, rtol=1e-5), "f32 path mismatch vs JAX reference"

    # 2) fast bf16-matmul path (intended precision tradeoff; f32 accumulation + f32 LayerNorm)
    prep_bf16 = prepare_params(params, matmul_dtype=jnp.bfloat16)
    out_bf16 = jax.block_until_ready(custom_adapter_bert_output(hidden_states, input_tensor, prep_bf16))
    assert out_bf16.shape == (batch, seq, hidden_size)
    assert jnp.allclose(out_bf16, ref, atol=2e-2, rtol=2e-2), "bf16 path mismatch vs JAX reference"

    print("KERNEL_OK")
</pallas_src>

<mosaic_0001>
module attributes {stable_mosaic.version = 11 : i64} {
  func.func @_fused_kernel(%arg0: i32, %arg1: memref<8x64xf32, #tpu.memory_space<vmem>>, %arg2: memref<8x32xf32, #tpu.memory_space<vmem>>, %arg3: memref<64x32xf32, #tpu.memory_space<vmem>>, %arg4: memref<32x32xf32, #tpu.memory_space<vmem>>, %arg5: memref<8x32xf32, #tpu.memory_space<vmem>>, %arg6: memref<8x32xf32, #tpu.memory_space<vmem>>) attributes {dimension_semantics = [#tpu.dimension_semantics<parallel>], iteration_bounds = array<i64: 2>, scalar_prefetch = 0 : i64, scratch_operands = 0 : i64, tpu.core_type = #tpu.core_type<tc>, window_params = [{transform_indices = @transform_0, window_bounds = array<i64: 8, 64>}, {transform_indices = @transform_1, window_bounds = array<i64: 8, 32>}, {pipeline_mode = #tpu.pipeline_mode<synchronous>, transform_indices = @transform_2, window_bounds = array<i64: 64, 32>}, {pipeline_mode = #tpu.pipeline_mode<synchronous>, transform_indices = @transform_3, window_bounds = array<i64: 32, 32>}, {pipeline_mode = #tpu.pipeline_mode<synchronous>, transform_indices = @transform_4, window_bounds = array<i64: 8, 32>}, {transform_indices = @transform_5, window_bounds = array<i64: 8, 32>}]} {
    %c0 = arith.constant 0 : index
    %c0_0 = arith.constant 0 : index
    %0 = vector.load %arg5[%c0, %c0_0] : memref<8x32xf32, #tpu.memory_space<vmem>>, vector<1x32xf32>
    %c1 = arith.constant 1 : index
    %c0_1 = arith.constant 0 : index
    %1 = vector.load %arg5[%c1, %c0_1] : memref<8x32xf32, #tpu.memory_space<vmem>>, vector<1x32xf32>
    %c2 = arith.constant 2 : index
    %c0_2 = arith.constant 0 : index
    %2 = vector.load %arg5[%c2, %c0_2] : memref<8x32xf32, #tpu.memory_space<vmem>>, vector<1x32xf32>
    %c3 = arith.constant 3 : index
    %c0_3 = arith.constant 0 : index
    %3 = vector.load %arg5[%c3, %c0_3] : memref<8x32xf32, #tpu.memory_space<vmem>>, vector<1x32xf32>
    %c0_4 = arith.constant 0 : index
    %c0_5 = arith.constant 0 : index
    %4 = vector.load %arg1[%c0_4, %c0_5] : memref<8x64xf32, #tpu.memory_space<vmem>>, vector<8x64xf32>
    %c0_6 = arith.constant 0 : index
    %c0_7 = arith.constant 0 : index
    %5 = vector.load %arg3[%c0_6, %c0_7] : memref<64x32xf32, #tpu.memory_space<vmem>>, vector<64x32xf32>
    %cst = arith.constant dense<0.000000e+00> : vector<8x32xf32>
    %6 = tpu.matmul %4, %5, %cst {dimension_numbers = #tpu.dot_dimension_numbers<[1], [0], [0], [1], [0, 0, 1, 1], [], []>} : vector<8x64xf32>, vector<64x32xf32>, vector<8x32xf32> -> vector<8x32xf32>
    %7 = vector.broadcast %0 : vector<1x32xf32> to vector<8x32xf32>
    %8 = arith.addf %6, %7 : vector<8x32xf32>
    %c0_8 = arith.constant 0 : index
    %c0_9 = arith.constant 0 : index
    %9 = vector.load %arg4[%c0_8, %c0_9] : memref<32x32xf32, #tpu.memory_space<vmem>>, vector<32x32xf32>
    %cst_10 = arith.constant dense<0.000000e+00> : vector<8x32xf32>
    %10 = tpu.matmul %8, %9, %cst_10 {dimension_numbers = #tpu.dot_dimension_numbers<[1], [0], [0], [1], [0, 0, 1, 1], [], []>} : vector<8x32xf32>, vector<32x32xf32>, vector<8x32xf32> -> vector<8x32xf32>
    %cst_11 = arith.constant 0.000000e+00 : f32
    %11 = vector.broadcast %cst_11 : f32 to vector<8x32xf32>
    %12 = arith.maximumf %10, %11 : vector<8x32xf32>
    %13 = vector.broadcast %1 : vector<1x32xf32> to vector<8x32xf32>
    %14 = arith.addf %12, %13 : vector<8x32xf32>
    %15 = arith.addf %8, %14 : vector<8x32xf32>
    %c0_12 = arith.constant 0 : index
    %c0_13 = arith.constant 0 : index
    %16 = vector.load %arg2[%c0_12, %c0_13] : memref<8x32xf32, #tpu.memory_space<vmem>>, vector<8x32xf32>
    %17 = arith.addf %15, %16 : vector<8x32xf32>
    %cst_14 = arith.constant dense<0.000000e+00> : vector<8xf32>
    %18 = vector.multi_reduction <add>, %17, %cst_14 [1] : vector<8x32xf32> to vector<8xf32>
    %19 = vector.shape_cast %18 : vector<8xf32> to vector<8x1xf32>
    %cst_15 = arith.constant 3.125000e-02 : f32
    %20 = vector.broadcast %cst_15 : f32 to vector<8x1xf32>
    %21 = arith.mulf %19, %20 : vector<8x1xf32>
    %22 = vector.broadcast %21 : vector<8x1xf32> to vector<8x32xf32>
    %23 = arith.subf %17, %22 : vector<8x32xf32>
    %24 = arith.mulf %23, %23 : vector<8x32xf32>
    %cst_16 = arith.constant dense<0.000000e+00> : vector<8xf32>
    %25 = vector.multi_reduction <add>, %24, %cst_16 [1] : vector<8x32xf32> to vector<8xf32>
    %26 = vector.shape_cast %25 : vector<8xf32> to vector<8x1xf32>
    %cst_17 = arith.constant 3.125000e-02 : f32
    %27 = vector.broadcast %cst_17 : f32 to vector<8x1xf32>
    %28 = arith.mulf %26, %27 : vector<8x1xf32>
    %cst_18 = arith.constant 9.99999996E-13 : f32
    %29 = vector.broadcast %cst_18 : f32 to vector<8x1xf32>
    %30 = arith.addf %28, %29 : vector<8x1xf32>
    %31 = math.rsqrt %30 : vector<8x1xf32>
    %32 = vector.broadcast %31 : vector<8x1xf32> to vector<8x32xf32>
    %33 = arith.mulf %23, %32 : vector<8x32xf32>
    %34 = vector.broadcast %2 : vector<1x32xf32> to vector<8x32xf32>
    %35 = arith.mulf %33, %34 : vector<8x32xf32>
    %36 = vector.broadcast %3 : vector<1x32xf32> to vector<8x32xf32>
    %37 = arith.addf %35, %36 : vector<8x32xf32>
    %c0_19 = arith.constant 0 : index
    %c0_20 = arith.constant 0 : index
    %38 = vector.load %arg6[%c0_19, %c0_20] : memref<8x32xf32, #tpu.memory_space<vmem>>, vector<8x32xf32>
    tpu.vector_store %arg6[%c0_19, %c0_20], %37 {strides = array<i32>} : memref<8x32xf32, #tpu.memory_space<vmem>>, vector<8x32xf32>,
    return
  }
  func.func @transform_0(%arg0: i32) -> (i32, i32) {
    %c0_i32 = arith.constant 0 : i32
    %c0_i32_0 = arith.constant 0 : i32
    return %arg0, %c0_i32 : i32, i32
  }
  func.func @transform_1(%arg0: i32) -> (i32, i32) {
    %c0_i32 = arith.constant 0 : i32
    %c0_i32_0 = arith.constant 0 : i32
    return %arg0, %c0_i32 : i32, i32
  }
  func.func @transform_2(%arg0: i32) -> (i32, i32) {
    %c0_i32 = arith.constant 0 : i32
    %c0_i32_0 = arith.constant 0 : i32
    %c0_i32_1 = arith.constant 0 : i32
    return %c0_i32, %c0_i32_0 : i32, i32
  }
  func.func @transform_3(%arg0: i32) -> (i32, i32) {
    %c0_i32 = arith.constant 0 : i32
    %c0_i32_0 = arith.constant 0 : i32
    %c0_i32_1 = arith.constant 0 : i32
    return %c0_i32, %c0_i32_0 : i32, i32
  }
  func.func @transform_4(%arg0: i32) -> (i32, i32) {
    %c0_i32 = arith.constant 0 : i32
    %c0_i32_0 = arith.constant 0 : i32
    %c0_i32_1 = arith.constant 0 : i32
    return %c0_i32, %c0_i32_0 : i32, i32
  }
  func.func @transform_5(%arg0: i32) -> (i32, i32) {
    %c0_i32 = arith.constant 0 : i32
    %c0_i32_0 = arith.constant 0 : i32
    return %arg0, %c0_i32 : i32, i32
  }
}

</mosaic_0001>

<bundles_post_ra>
// kernel: tpu_custom_call.1
= control target key start
LH: loop header
LB: loop body
LE: loop exit
PB: predicated region body
PF: predicated region fallthrough
CT: control target
= control target key end

     0   :  { %10 = vsyncpa [#allocation3], 0  ;;  %s718_s0 = inlined_call_operand.vmem [shape: f32[16,64], index: 0, kind: input, shape index: {}]   ;;  %s719_s1 = inlined_call_operand.vmem [shape: f32[16,32], index: 1, kind: input, shape index: {}]   ;;  %s720_s2 = inlined_call_operand.vmem [shape: f32[64,32], index: 2, kind: input, shape index: {}]   ;;  %s721_s3 = inlined_call_operand.vmem [shape: f32[32,32], index: 3, kind: input, shape index: {}]   ;;  %s722_s4 = inlined_call_operand.vmem [shape: f32[8,32], index: 4, kind: input, shape index: {}]   ;;  %s723_s5 = inlined_call_operand.hbm [shape: f32[16,32], index: 5, kind: output, shape index: {}]  }
   0x1   :  { %12 = vsyncpa [#allocation3 + $0x1], 0  ;;  %s575_s18 = smov 0   ;;  %s577_s19 = smov 0  }
   0x2   :  { %s579_s20 = smov 0   ;;  %s581_s21 = smov 0  }
   0x3 LB: > { %s596_s22 = sadd.s32 4294967295, %s543_s21   ;;  %s423_s23 = sadd.s32 4294967294, %s543_s21   ;;  %s543_s21 = sphi %s581_s21, %s729_s21   ;;  %s539_s20 = sphi %s579_s20, %s728_s20   ;;  %s535_s19 = sphi %s577_s19, %s727_s19   ;;  %s531_s18 = sphi %s575_s18, %s726_s18  }
   0x4   : > { %s600_s24 = sadd.s32 1, %s543_s21   ;;  %s140_s25 = sadd.s32 1, %s539_s20 }
   0x5   : > { %s137_s26 = ssub.s32 %s543_s21, %s600_s24  ;;  %p150_p0 = scmp.ne.s32.totalorder %s539_s20, %s535_s19 }
   0x6   : > { %p138_p1 = scmp.eq.s32.totalorder %s137_s26, 0  ;;  %p151_p2 = scmp.eq.s32.totalorder %s596_s22, 1 }
   0x7   : > { %p156_p3 = scmp.ne.s32.totalorder %s535_s19, %s531_s18  ;;  %p157_p4 = scmp.eq.s32.totalorder %s423_s23, 1 }
   0x8   : > { %s611_s27 = scalar_select %p138_p1, %s539_s20, %s140_s25  }
   0x9   : > { %p613_p5 = por %p151_p2, %p150_p0  ;;  %p617_p6 = por %p157_p4, %p156_p3 }
   0xa   : > { %p426_p7 = scmp.ge.s32.totalorder %s543_s21, 1  ;;  %p198_p8 = scmp.lt.s32.totalorder %s543_s21, 3 }
   0xc   : > { %p199_p9 = pnand %p426_p7, %p198_p8 }
   0xd   : > { %p229_p10 = scmp.lt.s32.totalorder (!%p199_p9), %s596_s22, 1 }
   0xe   : > { %202 = sbr.rel (%p199_p9) target bundleno = 568 (0x238), region = 40 }
  0x13   : > { %v249_v0 = vld [vmem:[%s720_s2 + $0x38] sm:$0xff]  ;;  %v248_v1 = vld [vmem:[%s720_s2 + $0x30] sm:$0xff]  ;;  %v247_v2 = vld [vmem:[%s720_s2 + $0x28] sm:$0xff]  ;;  %s637_s13 = scalar_select %p229_p10, %s596_s22, 1  ;;  %vm251_vm0 = vcmask 523264   ;;  %vm279_vm1 = vcmask 261120  }
  0x14   : > { %263 = vmatpush.msra.mxu0 %v249_v0  ;;  %v278_v3 = vld [vmem:[%s721_s3 + $0x18] sm:$0xff]  ;;  %v277_v4 = vld [vmem:[%s721_s3 + $0x10] sm:$0xff]  ;;  %v246_v5 = vld [vmem:[%s720_s2 + $0x20] sm:$0xff] }
  0x15   : > { %295 = vmatpush.msra.mxu1 %v278_v3  ;;  %v245_v6 = vld [vmem:[%s720_s2 + $0x18] sm:$0xff]  ;;  %s428_s26 = sshll.u32 %s637_s13, 3  ;;  %v244_v7 = vld [vmem:[%s720_s2 + $0x10] sm:$0xff]  ;;  %v243_v8 = vld [vmem:[%s720_s2 + $0x8] sm:$0xff] }
  0x16   : > { %264 = vmatpush.msra.mxu0 %v248_v1  ;;  %s232_s11 = scalar_lea.vmem %s718_s0, %s428_s26  ;;  %v242_v9 = vld [vmem:[%s720_s2] sm:$0xff]  ;;  %v276_v11 = vld [vmem:[%s721_s3 + $0x8] sm:$0xff]  ;;  %s236_s9 = scalar_lea.vmem %s719_s1, %s428_s26 }
  0x17   : > { %296 = vmatpush.msra.mxu1 %v277_v4  ;;  %v241_v10 = vld [vmem:[%s232_s11] sm:$0xff]  ;;  %s226_s26 = sand.u32 1, %s535_s19   ;;  %s433_s11 = sshll.u32 %s596_s22, 3 }
  0x18   : > { %265 = vmatpush.msra.mxu0 %v247_v2  ;;  %v275_v12 = vld [vmem:[%s721_s3] sm:$0xff]  ;;  %s427_s10 = sshll.u32 %s226_s26, 3  ;;  %s347_s16 = scalar_lea.hbm %s723_s5, %s433_s11 }
  0x19   : > { %297 = vmatpush.msra.mxu1 %v276_v11  ;;  %v475_v13 = vld [vmem:[%s722_s4] ss:$0 sm:$0xff]  ;;  %v476_v16 = vld [vmem:[%s722_s4 + $0x1] ss:$0 sm:$0xff]  ;;  %v477_v38 = vld [vmem:[%s722_s4 + $0x2] ss:$0 sm:$0xff] }
  0x1a   : > { %266 = vmatpush.msra.mxu0 %v246_v5  ;;  %v307_v20 = vld [vmem:[%s236_s9] sm:$0xff]  ;;  %s228_s25 = scalar_lea.vmem [#allocation2], %s427_s10  ;;  %s351_s30 = sshll.u32 %s347_s16, 4  ;;  %s352_s30 = int_to_ptr.hbm [resolvable:$true] %s351_s30 }
  0x1b   : > { %298 = vmatpush.msra.mxu1 %v275_v12  ;;  %v478_v41 = vld [vmem:[%s722_s4 + $0x3] ss:$0 sm:$0xff]  ;;  %s349_s22 = sshll.u32 %s228_s25, 4  ;;  %s337_s6 = scalar_lea.sflag [#allocation3], %s226_s26  ;;  %s350_s22 = int_to_ptr.vmem [resolvable:$true] %s349_s22 }
  0x1c   : > { %267 = vmatpush.msra.mxu0 %v245_v6  ;;  %s495_s7 = sshra.s32 %s352_s30, 4  ;;  %s501_s10 = scalar_lea.hbm %s723_s5, 16  ;;  %s496_s7 = int_to_ptr.hbm [resolvable:$true] %s495_s7 }
  0x1d   : > { %s497_s8 = scalar_lea.hbm %s496_s7, 8  ;;  %p502_p0 = scmp.lt.s32.totalorder %s496_s7, %s723_s5 }
  0x1e   : > { %268 = vmatpush.msra.mxu0 %v244_v7  ;;  %p498_p11 = scmp.ne.s32.totalorder %s496_s7, %s497_s8  ;;  %p503_p1 = scmp.lt.s32.totalorder %s501_s10, %s497_s8 }
  0x20   : > { %269 = vmatpush.msra.mxu0 %v243_v8  ;;  %p499_p12 = pnand %p498_p11, %p613_p5  ;;  %p504_p2 = por %p503_p1, %p502_p0 }
  0x22   : > { %270 = vmatpush.msra.mxu0 %v242_v9  ;;  %p500_p13 = pneg %p499_p12 }
  0x23   : > { %430 = vmatmul.msk.f32.vlgmr.msra.gmra.mxu0 %vm251_vm0, %v241_v10 }
  0x24   : > { %p505_p3 = pnand %p504_p2, %p500_p13 }
  0xa0   : > { %v272_v14 = vpop.f32.mrf.mxu0 }
  0xa1   : > { %v273_v15 = vadd.f32 %v475_v13, %v272_v14 }
  0xa3   : > { %431 = vmatmul.msk.f32.vlgmr.msra.gmra.mxu1 %vm279_vm1, %v273_v15 }
 0x120   : > { %v300_v17 = vpop.f32.mrf.mxu1 }
 0x121   : > { %v303_v18 = vmax.f32 %v300_v17, 0.0 }
 0x123   : > { %v305_v19 = vadd.f32 %v476_v16, %v303_v18 }
 0x125   : > { %v306_v21 = vadd.f32 %v305_v19, %v273_v15 }
 0x127   : > { %v308_v22 = vadd.f32 %v307_v20, %v306_v21 }
 0x129   : > { %v309_v23 = vsel %vm279_vm1, %v308_v22, 0.0 }
 0x12a   : > { %310 = vadd.xlane.f32.xlu0 %v309_v23 }
 0x19d   : > { %v311_v24 = vpop.xlane.xlu0 %310 }
 0x19e   : > { %v312_v25 = vmul.f32 0.03125, %v311_v24 }
 0x1a0   : > { %v313_v26 = vsub.f32 %v308_v22, %v312_v25 }
 0x1a2   : > { %v314_v27 = vmul.f32 %v313_v26, %v313_v26 }
 0x1a4   : > { %v315_v28 = vsel %vm279_vm1, %v314_v27, 0.0 }
 0x1a5   : > { %316 = vadd.xlane.f32.xlu0 %v315_v28 }
 0x218   : > { %v317_v29 = vpop.xlane.xlu0 %316 }
 0x219   : > { %v318_v30 = vmul.f32 0.03125, %v317_v29 }
 0x21b   : > { %v319_v31 = vadd.f32 1e-12, %v318_v30 }
 0x21d   : > { %479 = vrsqrt.f32 %v319_v31  ;;  %vm326_vm3 = vweird.f32 %v319_v31 }
 0x223   : > { %v480_v32 = vpop.eup %479 }
 0x224   : > { %v321_v33 = vmul.f32 %v480_v32, %v319_v31  ;;  %vm327_vm2 = vweird.f32 %v480_v32 }
 0x225   : > { %vm328_vm4 = vmor %vm326_vm3, %vm327_vm2 }
 0x226   : > { %v322_v34 = vmul.f32 %v480_v32, %v321_v33 }
 0x228   : > { %v323_v35 = vmul.f32 0.5, %v322_v34 }
 0x22a   : > { %v324_v36 = vsub.f32 1.5, %v323_v35 }
 0x22c   : > { %v325_v37 = vmul.f32 %v480_v32, %v324_v36 }
 0x22e   : > { %v329_v39 = vsel %vm328_vm4, %v480_v32, %v325_v37 }
 0x22f   : > { %v330_v40 = vmul.f32 %v329_v39, %v313_v26 }
 0x231   : > { %v332_v42 = vmul.f32 %v477_v38, %v330_v40 }
 0x233   : > { %v334_v43 = vadd.f32 %v478_v41, %v332_v42 }
 0x235   : > { %335 = vst.msk [vmem:[%s228_s25] sm:$0xff] %vm279_vm1, %v334_v43 }
 0x236   : > { %508 = shalt.err (!%p505_p3)
}
 0x237   : > { %436 = dma.vmem_to_hbm [thread:$0]  (%p613_p5), %s350_s22, 128, %s352_s30, %s337_s6  }
 0x238 PF: > { %p442_p4 = scmp.ge.s32.totalorder %s543_s21, 2  ;;  %s363_s26 = sand.u32 1, %s531_s18  }
 0x239   : > { %s364_s13 = scalar_lea.sflag [#allocation3], %s363_s26 }
 0x23a   : > { %p439_p7 = pnand %p442_p4, %p617_p6 }
 0x23c   : > { %p440_p8 = pneg %p439_p7 }
 0x23e   : > { %526 = dma.done.wait (%p440_p8), %s364_s13, 128  }
 0x23f   : > { %528 = vsyncadd (%p440_p8), %s364_s13, 4294967168  ;;  %p15_p9 = scmp.ge.s32.totalorder %s600_s24, 4   ;;  %s726_s18 = smov %s535_s19 }
 0x240   : > { %s727_s19 = smov %s539_s20  ;;  %s728_s20 = smov %s611_s27 }
 0x241   : > { %s729_s21 = smov %s600_s24  ;;  %17 = sbr.rel (!%p15_p9) target bundleno = 3 (0x3), region = 78 }
 0x246   :  { %370 = vsyncpa [#allocation3], 1 }
 0x247   :  { %372 = vsyncpa [#allocation3 + $0x1], 1 }

</bundles_post_ra>
